<compile_context>
chip_gen: v7x
topology: tpu7x:2x2x1
jax: 0.10.0
libtpu: 0.0.40
codegen_flags: <defaults>
</compile_context>

<pallas_src>
import jax
import jax.numpy as jnp
from jax.experimental import pallas as pl
from jax.experimental.pallas import tpu as pltpu

_OUT_PAD = 128  # lane-dense score slab width (column 0 holds the real score)
_SUB = 16       # bf16 sublane packing for the batch dim


def _round_up(x, m):
    return -(-x // m) * m


def _cdiv(a, b):
    return -(-a // b)


def _vmem_footprint(tm, tk, feat):
    """Bytes of VMEM the pipelined kernel needs for one batch tile."""
    return (2 * tm * tk * 2            # x tile, double-buffered bf16
            + 2 * tk * feat * 2        # streamed w_enc slab, double-buffered bf16
            + tm * feat * 4            # f32 accumulator scratch
            + 2 * tm * _OUT_PAD * 4    # output slab, double-buffered f32
            + 2 * feat * _OUT_PAD * 4  # folded MLP weight (grid-invariant)
            + 2 * (feat + _OUT_PAD) * 4 * 8)  # biases + slack


def aesthetic_scorer_kernel(x_ref, we_ref, be_ref, wf_ref, bf_ref, o_ref, acc_ref):
    k = pl.program_id(1)

    @pl.when(k == 0)
    def _init():
        acc_ref[...] = jnp.zeros_like(acc_ref)

    # encoder stand-in: bf16 x @ bf16 w_enc, accumulated in f32 across the K grid axis
    acc_ref[...] += jnp.dot(x_ref[...], we_ref[...], preferred_element_type=jnp.float32)

    @pl.when(k == pl.num_programs(1) - 1)
    def _finalize():
        feats = acc_ref[...] + be_ref[...]                       # f32
        # F.normalize(x, p=2, dim=-1): x / max(||x||, 1e-12) == x * rsqrt(max(||x||^2, 1e-24))
        sq = jnp.sum(feats * feats, axis=-1, keepdims=True)
        feats = feats * jax.lax.rsqrt(jnp.maximum(sq, 1e-24))
        # folded MLP (single affine map), lane-dense padded output. One MXU pass per batch
        # tile -> intentionally left as a padded matmul (never on the critical path).
        score = jnp.dot(feats, wf_ref[...], preferred_element_type=jnp.float32) + bf_ref[...]
        o_ref[...] = score.astype(o_ref.dtype)


def prepare_scorer_params(params, *, tk=3072, enc_dtype=jnp.bfloat16):
    """One-time (model-load) preprocessing.

    Folds the purely-linear MLP into a single affine map, pads it to a lane-dense slab, and
    pre-casts / pre-pads the encoder weight to bf16 so nothing weight-sized is materialized
    per call.
    """
    K, feat = params["w_enc"].shape
    if K <= tk:
        tk = _round_up(K, 128)          # single K step for small K
    K_pad = _round_up(K, tk)

    # ---- fold the 5 Linear layers (Dropout = identity in eval) into W_fold, b_fold (f32) ----
    w_fold = params["w1"] @ params["w2"] @ params["w3"] @ params["w4"] @ params["w5"]   # (feat, 1)
    b_fold = ((((params["b1"] @ params["w2"] + params["b2"]) @ params["w3"] + params["b3"])
               @ params["w4"] + params["b4"]) @ params["w5"] + params["b5"])            # (1, 1)
    w_fold_p = jnp.zeros((feat, _OUT_PAD), jnp.float32).at[:, :1].set(w_fold.astype(jnp.float32))
    b_fold_p = jnp.zeros((1, _OUT_PAD), jnp.float32).at[:, :1].set(b_fold.astype(jnp.float32))

    # ---- pre-cast / pre-pad the encoder weight (no per-call copy) ----
    if K_pad == K:
        w_enc_p = params["w_enc"].astype(enc_dtype)
    else:
        w_enc_p = jnp.zeros((K_pad, feat), enc_dtype).at[:K, :].set(
            params["w_enc"].astype(enc_dtype))
    b_enc = params["b_enc"].astype(jnp.float32).reshape(1, feat)

    return {
        "w_enc": w_enc_p, "b_enc": b_enc,
        "w_fold": w_fold_p, "b_fold": b_fold_p,
        "K": K, "K_pad": K_pad, "tk": tk, "feat": feat, "enc_dtype": enc_dtype,
    }


def aesthetic_scorer(x_nchw, prepared, *, num_batch_tiles=None,
                     vmem_budget_bytes=40 << 20, vmem_headroom_bytes=4 << 20):
    """x_nchw: (B, C, H, W) float32 images. prepared: output of prepare_scorer_params.
    Returns (B, 1) scores.

    num_batch_tiles: default None -> single batch tile (w_enc streamed exactly once), split
    only if the per-tile VMEM footprint would exceed vmem_budget_bytes. Pass 2 on v7x to
    shard the batch axis across both TensorCores.
    """
    B = x_nchw.shape[0]
    x_flat = x_nchw.reshape(B, -1)
    K, K_pad, tk, feat = prepared["K"], prepared["K_pad"], prepared["tk"], prepared["feat"]
    enc_dtype = prepared["enc_dtype"]
    assert x_flat.shape[1] == K, f"pixel dim {x_flat.shape[1]} != prepared K {K}"

    # ---- batch tiling: prefer ONE tile so w_enc streams from HBM exactly once ----
    if num_batch_tiles is None:
        num_batch_tiles = 1
        while True:
            tm = _round_up(_cdiv(B, num_batch_tiles), _SUB)
            if _vmem_footprint(tm, tk, feat) <= vmem_budget_bytes or tm <= 256:
                break
            num_batch_tiles += 1
    tm = _round_up(_cdiv(B, num_batch_tiles), _SUB)
    B_pad = tm * num_batch_tiles

    # ---- per-call x prep: only cast + cheap batch pad (K pad only if tk doesn't divide K) ----
    x_p = x_flat.astype(enc_dtype)
    if B_pad != B or K_pad != K:
        x_p = jnp.pad(x_p, ((0, B_pad - B), (0, K_pad - K)))

    grid = (num_batch_tiles, K_pad // tk)
    vmem_limit = int(min(_vmem_footprint(tm, tk, feat) + vmem_headroom_bytes, 100 << 20))

    out = pl.pallas_call(
        aesthetic_scorer_kernel,
        out_shape=jax.ShapeDtypeStruct((B_pad, _OUT_PAD), jnp.float32),
        grid_spec=pltpu.PrefetchScalarGridSpec(
            num_scalar_prefetch=0,
            grid=grid,
            in_specs=[
                pl.BlockSpec((tm, tk), lambda i, k: (i, k)),          # x tile
                pl.BlockSpec((tk, feat), lambda i, k: (k, 0)),        # streamed w_enc slab
                pl.BlockSpec((1, feat), lambda i, k: (0, 0)),         # b_enc (grid-invariant)
                pl.BlockSpec((feat, _OUT_PAD), lambda i, k: (0, 0)),  # folded MLP weight
                pl.BlockSpec((1, _OUT_PAD), lambda i, k: (0, 0)),     # folded MLP bias
            ],
            out_specs=pl.BlockSpec((tm, _OUT_PAD), lambda i, k: (i, 0)),
            scratch_shapes=[pltpu.VMEM((tm, feat), jnp.float32)],     # f32 accumulator
        ),
        compiler_params=pltpu.CompilerParams(
            dimension_semantics=("parallel", "arbitrary"),
            vmem_limit_bytes=vmem_limit),
    )(x_p, prepared["w_enc"], prepared["b_enc"], prepared["w_fold"], prepared["b_fold"])

    return out[:B, :1]


def init_params(key, pixel_dim, feat_dim):
    """Deterministic PyTorch-Linear-style init (uniform +/- 1/sqrt(fan_in))."""
    dims = [(pixel_dim, feat_dim),   # encoder stand-in
            (feat_dim, 1024),
            (1024, 128),
            (128, 64),
            (64, 16),
            (16, 1)]
    names = ["enc", "1", "2", "3", "4", "5"]
    params = {}
    for (fan_in, fan_out), name in zip(dims, names):
        key, kw, kb = jax.random.split(key, 3)
        bound = 1.0 / (fan_in ** 0.5)
        w = jax.random.uniform(kw, (fan_in, fan_out), jnp.float32, -bound, bound)
        b = jax.random.uniform(kb, (1, fan_out), jnp.float32, -bound, bound)
        params["w_enc" if name == "enc" else f"w{name}"] = w
        params["b_enc" if name == "enc" else f"b{name}"] = b
    return params


def reference(x_nchw, params, enc_dtype=jnp.bfloat16):
    """Pure-JAX reference of the same forward (layer-by-layer MLP), for correctness check."""
    B = x_nchw.shape[0]
    x = x_nchw.reshape(B, -1)
    feats = jnp.dot(x.astype(enc_dtype), params["w_enc"].astype(enc_dtype),
                    preferred_element_type=jnp.float32) + params["b_enc"]
    norm = jnp.sqrt(jnp.sum(feats * feats, axis=-1, keepdims=True))
    feats = feats / jnp.maximum(norm, 1e-12)
    h = feats @ params["w1"] + params["b1"]
    h = h @ params["w2"] + params["b2"]
    h = h @ params["w3"] + params["b3"]
    h = h @ params["w4"] + params["b4"]
    h = h @ params["w5"] + params["b5"]
    return h


if __name__ == "__main__":
    # Small shapes consistent with the module: NCHW image batch.
    B, C, H, W = 2, 4, 16, 16          # image input (stand-in for 3x224x224)
    FEAT_DIM = 256                     # input_size of the MLP (CLIP feature dim stand-in)

    key = jax.random.PRNGKey(0)
    key, kx = jax.random.split(key)
    x = jax.random.normal(kx, (B, C, H, W), jnp.float32)

    params = init_params(key, pixel_dim=C * H * W, feat_dim=FEAT_DIM)

    # One-time model-load path: MLP fold + w_enc bf16 cast/pad (NOT per call).
    prepared = prepare_scorer_params(params)

    out = jax.block_until_ready(aesthetic_scorer(x, prepared))
    ref = reference(x, params)

    assert out.shape == (B, 1)
    assert jnp.allclose(out, ref, atol=1e-3, rtol=1e-3)

    print("KERNEL_OK")
</pallas_src>

<mosaic_0001>
module attributes {stable_mosaic.version = 11 : i64} {
  func.func @aesthetic_scorer_kernel(%arg0: i32, %arg1: i32, %arg2: memref<16x1024xbf16, #tpu.memory_space<vmem>>, %arg3: memref<1024x256xbf16, #tpu.memory_space<vmem>>, %arg4: memref<1x256xf32, #tpu.memory_space<vmem>>, %arg5: memref<256x128xf32, #tpu.memory_space<vmem>>, %arg6: memref<1x128xf32, #tpu.memory_space<vmem>>, %arg7: memref<16x128xf32, #tpu.memory_space<vmem>>, %arg8: memref<16x256xf32, #tpu.memory_space<vmem>>) attributes {dimension_semantics = [#tpu.dimension_semantics<parallel>, #tpu.dimension_semantics<arbitrary>], iteration_bounds = array<i64: 1, 1>, scalar_prefetch = 0 : i64, scratch_operands = 1 : i64, tpu.core_type = #tpu.core_type<tc>, window_params = [{transform_indices = @transform_0, window_bounds = array<i64: 16, 1024>}, {transform_indices = @transform_1, window_bounds = array<i64: 1024, 256>}, {pipeline_mode = #tpu.pipeline_mode<synchronous>, transform_indices = @transform_2, window_bounds = array<i64: 1, 256>}, {pipeline_mode = #tpu.pipeline_mode<synchronous>, transform_indices = @transform_3, window_bounds = array<i64: 256, 128>}, {pipeline_mode = #tpu.pipeline_mode<synchronous>, transform_indices = @transform_4, window_bounds = array<i64: 1, 128>}, {transform_indices = @transform_5, window_bounds = array<i64: 16, 128>}]} {
    %c0_i32 = arith.constant 0 : i32
    %0 = arith.cmpi eq, %arg1, %c0_i32 : i32
    %1 = arith.extui %0 : i1 to i32
    %c0_i32_0 = arith.constant 0 : i32
    %2 = arith.cmpi ne, %1, %c0_i32_0 : i32
    scf.if %2 {
      %cst_10 = arith.constant 0.000000e+00 : f32
      %12 = vector.broadcast %cst_10 : f32 to vector<16x256xf32>
      %c0_11 = arith.constant 0 : index
      %c0_12 = arith.constant 0 : index
      %13 = vector.load %arg8[%c0_11, %c0_12] : memref<16x256xf32, #tpu.memory_space<vmem>>, vector<16x256xf32>
      tpu.vector_store %arg8[%c0_11, %c0_12], %12 {strides = array<i32>} : memref<16x256xf32, #tpu.memory_space<vmem>>, vector<16x256xf32>,
    } else {
    }
    %c0 = arith.constant 0 : index
    %c0_1 = arith.constant 0 : index
    %3 = vector.load %arg8[%c0, %c0_1] : memref<16x256xf32, #tpu.memory_space<vmem>>, vector<16x256xf32>
    %c0_2 = arith.constant 0 : index
    %c0_3 = arith.constant 0 : index
    %4 = vector.load %arg2[%c0_2, %c0_3] : memref<16x1024xbf16, #tpu.memory_space<vmem>>, vector<16x1024xbf16>
    %c0_4 = arith.constant 0 : index
    %c0_5 = arith.constant 0 : index
    %5 = vector.load %arg3[%c0_4, %c0_5] : memref<1024x256xbf16, #tpu.memory_space<vmem>>, vector<1024x256xbf16>
    %cst = arith.constant dense<0.000000e+00> : vector<16x256xf32>
    %6 = tpu.matmul %4, %5, %cst {dimension_numbers = #tpu.dot_dimension_numbers<[1], [0], [0], [1], [0, 0, 1, 1], [], []>} : vector<16x1024xbf16>, vector<1024x256xbf16>, vector<16x256xf32> -> vector<16x256xf32>
    %7 = arith.addf %3, %6 : vector<16x256xf32>
    %c0_6 = arith.constant 0 : index
    %c0_7 = arith.constant 0 : index
    %8 = vector.load %arg8[%c0_6, %c0_7] : memref<16x256xf32, #tpu.memory_space<vmem>>, vector<16x256xf32>
    tpu.vector_store %arg8[%c0_6, %c0_7], %7 {strides = array<i32>} : memref<16x256xf32, #tpu.memory_space<vmem>>, vector<16x256xf32>,
    %c0_i32_8 = arith.constant 0 : i32
    %9 = arith.cmpi eq, %arg1, %c0_i32_8 : i32
    %10 = arith.extui %9 : i1 to i32
    %c0_i32_9 = arith.constant 0 : i32
    %11 = arith.cmpi ne, %10, %c0_i32_9 : i32
    scf.if %11 {
      %c0_10 = arith.constant 0 : index
      %c0_11 = arith.constant 0 : index
      %12 = vector.load %arg8[%c0_10, %c0_11] : memref<16x256xf32, #tpu.memory_space<vmem>>, vector<16x256xf32>
      %c0_12 = arith.constant 0 : index
      %c0_13 = arith.constant 0 : index
      %13 = vector.load %arg4[%c0_12, %c0_13] : memref<1x256xf32, #tpu.memory_space<vmem>>, vector<1x256xf32>
      %14 = vector.broadcast %13 : vector<1x256xf32> to vector<16x256xf32>
      %15 = arith.addf %12, %14 : vector<16x256xf32>
      %16 = arith.mulf %15, %15 : vector<16x256xf32>
      %cst_14 = arith.constant dense<0.000000e+00> : vector<16xf32>
      %17 = vector.multi_reduction <add>, %16, %cst_14 [1] : vector<16x256xf32> to vector<16xf32>
      %18 = vector.shape_cast %17 : vector<16xf32> to vector<16x1xf32>
      %cst_15 = arith.constant 1.000000e-24 : f32
      %19 = vector.broadcast %cst_15 : f32 to vector<16x1xf32>
      %20 = arith.maximumf %18, %19 : vector<16x1xf32>
      %21 = math.rsqrt %20 : vector<16x1xf32>
      %22 = vector.broadcast %21 : vector<16x1xf32> to vector<16x256xf32>
      %23 = arith.mulf %15, %22 : vector<16x256xf32>
      %c0_16 = arith.constant 0 : index
      %c0_17 = arith.constant 0 : index
      %24 = vector.load %arg5[%c0_16, %c0_17] : memref<256x128xf32, #tpu.memory_space<vmem>>, vector<256x128xf32>
      %cst_18 = arith.constant dense<0.000000e+00> : vector<16x128xf32>
      %25 = tpu.matmul %23, %24, %cst_18 {dimension_numbers = #tpu.dot_dimension_numbers<[1], [0], [0], [1], [0, 0, 1, 1], [], []>} : vector<16x256xf32>, vector<256x128xf32>, vector<16x128xf32> -> vector<16x128xf32>
      %c0_19 = arith.constant 0 : index
      %c0_20 = arith.constant 0 : index
      %26 = vector.load %arg6[%c0_19, %c0_20] : memref<1x128xf32, #tpu.memory_space<vmem>>, vector<1x128xf32>
      %27 = vector.broadcast %26 : vector<1x128xf32> to vector<16x128xf32>
      %28 = arith.addf %25, %27 : vector<16x128xf32>
      %c0_21 = arith.constant 0 : index
      %c0_22 = arith.constant 0 : index
      %29 = vector.load %arg7[%c0_21, %c0_22] : memref<16x128xf32, #tpu.memory_space<vmem>>, vector<16x128xf32>
      tpu.vector_store %arg7[%c0_21, %c0_22], %28 {strides = array<i32>} : memref<16x128xf32, #tpu.memory_space<vmem>>, vector<16x128xf32>,
    } else {
    }
    return
  }
  func.func @transform_0(%arg0: i32, %arg1: i32) -> (i32, i32) {
    %c0_i32 = arith.constant 0 : i32
    return %arg0, %arg1 : i32, i32
  }
  func.func @transform_1(%arg0: i32, %arg1: i32) -> (i32, i32) {
    %c0_i32 = arith.constant 0 : i32
    %c0_i32_0 = arith.constant 0 : i32
    return %arg1, %c0_i32 : i32, i32
  }
  func.func @transform_2(%arg0: i32, %arg1: i32) -> (i32, i32) {
    %c0_i32 = arith.constant 0 : i32
    %c0_i32_0 = arith.constant 0 : i32
    %c0_i32_1 = arith.constant 0 : i32
    return %c0_i32, %c0_i32_0 : i32, i32
  }
  func.func @transform_3(%arg0: i32, %arg1: i32) -> (i32, i32) {
    %c0_i32 = arith.constant 0 : i32
    %c0_i32_0 = arith.constant 0 : i32
    %c0_i32_1 = arith.constant 0 : i32
    return %c0_i32, %c0_i32_0 : i32, i32
  }
  func.func @transform_4(%arg0: i32, %arg1: i32) -> (i32, i32) {
    %c0_i32 = arith.constant 0 : i32
    %c0_i32_0 = arith.constant 0 : i32
    %c0_i32_1 = arith.constant 0 : i32
    return %c0_i32, %c0_i32_0 : i32, i32
  }
  func.func @transform_5(%arg0: i32, %arg1: i32) -> (i32, i32) {
    %c0_i32 = arith.constant 0 : i32
    %c0_i32_0 = arith.constant 0 : i32
    return %arg0, %c0_i32 : i32, i32
  }
}

</mosaic_0001>

<bundles_post_ra>
// kernel: tpu_custom_call.1
= control target key start
LH: loop header
LB: loop body
LE: loop exit
PB: predicated region body
PF: predicated region fallthrough
CT: control target
= control target key end

     0   :  { %10 = vsyncpa [#allocation4], 0  ;;  %s1905_s0 = inlined_call_operand.hbm [shape: bf16[16,1024], index: 0, kind: input, shape index: {}]   ;;  %s1906_s1 = inlined_call_operand.hbm [shape: bf16[1024,256], index: 1, kind: input, shape index: {}]   ;;  %s1907_s2 = inlined_call_operand.vmem [shape: f32[1,256], index: 2, kind: input, shape index: {}]   ;;  %s1908_s3 = inlined_call_operand.hbm [shape: f32[256,128], index: 3, kind: input, shape index: {}]   ;;  %s1909_s4 = inlined_call_operand.vmem [shape: f32[1,128], index: 4, kind: input, shape index: {}]   ;;  %s1910_s5 = inlined_call_operand.hbm [shape: f32[16,128], index: 5, kind: output, shape index: {}]  }
   0x1   :  { %11 = vsyncpa [#allocation7], 0 }
   0x2   :  { %12 = vsyncpa [#allocation5], 0  ;;  %s1778_s18 = smov [#allocation6]   ;;  %s1684_s22 = scalar_lea.hbm %s1906_s1, 16384 }
   0x3   :  { %s30_s19 = sshll.u32 %s1778_s18, 4  ;;  %p1685_p0 = scmp.ne.s32.totalorder %s1906_s1, %s1684_s22  ;;  %s31_s19 = int_to_ptr.vmem [resolvable:$true] %s30_s19 }
   0x4   :  { %p1688_p1 = scmp.lt.u32.totalorder %s1684_s22, %s1906_s1 }
   0x6   :  { %p1690_p2 = pnand %p1688_p1, %p1685_p0 }
   0x8   :  { %1693 = shalt.err (!%p1690_p2)
}
   0x9   :  { %s1694_s27 = scalar_lea.vmem %s31_s19, 16384  ;;  %p1699_p4 = scmp.lt.s32.totalorder %s31_s19, %s31_s19 }
   0xa   :  { %p1695_p3 = scmp.ne.s32.totalorder %s31_s19, %s1694_s27  ;;  %p1700_p5 = scmp.lt.s32.totalorder %s1694_s27, %s1694_s27 }
   0xc   :  { %p1701_p6 = por %p1700_p5, %p1699_p4 }
   0xe   :  { %p1702_p7 = pnand %p1701_p6, %p1695_p3 }
  0x10   :  { %1705 = shalt.err (!%p1702_p7)
}
  0x11   :  { %s1779_s28 = smov 128   ;;  %s1780_s29 = smov 8  }
  0x12   :  { %36 = dma.hbm_to_vmem [thread:$0]  %s1906_s1, 16384, %s31_s19, [#allocation7], %s1779_s28, %s1779_s28, %s1780_s29  }
  0x13   :  { %s1781_s7 = smov [#allocation3]   ;;  %s1706_s11 = scalar_lea.hbm %s1905_s0, 1024 }
  0x14   :  { %s18_s8 = sshll.u32 %s1781_s7, 4  ;;  %p1707_p8 = scmp.ne.s32.totalorder %s1905_s0, %s1706_s11  ;;  %s19_s8 = int_to_ptr.vmem [resolvable:$true] %s18_s8 }
  0x15   :  { %p1710_p9 = scmp.lt.u32.totalorder %s1706_s11, %s1905_s0 }
  0x17   :  { %p1712_p10 = pnand %p1710_p9, %p1707_p8 }
  0x19   :  { %1715 = shalt.err (!%p1712_p10)
}
  0x1a   :  { %s1716_s16 = scalar_lea.vmem %s19_s8, 1024  ;;  %p1721_p12 = scmp.lt.s32.totalorder %s19_s8, %s19_s8 }
  0x1b   :  { %p1717_p11 = scmp.ne.s32.totalorder %s19_s8, %s1716_s16  ;;  %p1722_p13 = scmp.lt.s32.totalorder %s1716_s16, %s1716_s16 }
  0x1d   :  { %p1723_p0 = por %p1722_p13, %p1721_p12 }
  0x1f   :  { %p1724_p1 = pnand %p1723_p0, %p1717_p11 }
  0x21   :  { %1727 = shalt.err (!%p1724_p1)
}
  0x22   :  { %s1782_s1 = smov 512   ;;  %s1783_s17 = smov 32  }
  0x23   :  { %24 = dma.hbm_to_vmem [thread:$0]  %s1905_s0, 1024, %s19_s8, [#allocation4], %s1782_s1, %s1782_s1, %s1783_s17  }
  0x24   :  { %s1784_s20 = smov [#allocation8]   ;;  %s1728_s24 = scalar_lea.hbm %s1908_s3, 4096 }
  0x25   :  { %s44_s21 = sshll.u32 %s1784_s20, 4  ;;  %p1729_p2 = scmp.ne.s32.totalorder %s1908_s3, %s1728_s24  ;;  %s45_s21 = int_to_ptr.vmem [resolvable:$true] %s44_s21 }
  0x26   :  { %p1732_p3 = scmp.lt.u32.totalorder %s1728_s24, %s1908_s3 }
  0x28   :  { %p1734_p4 = pnand %p1732_p3, %p1729_p2 }
  0x2a   :  { %1737 = shalt.err (!%p1734_p4)
}
  0x2b   :  { %s1738_s6 = scalar_lea.vmem %s45_s21, 4096  ;;  %p1743_p6 = scmp.lt.s32.totalorder %s45_s21, %s45_s21 }
  0x2c   :  { %p1739_p5 = scmp.ne.s32.totalorder %s45_s21, %s1738_s6  ;;  %p1744_p7 = scmp.lt.s32.totalorder %s1738_s6, %s1738_s6 }
  0x2e   :  { %p1745_p8 = por %p1744_p7, %p1743_p6 }
  0x30   :  { %p1746_p9 = pnand %p1745_p8, %p1739_p5 }
  0x32   :  { %1749 = shalt.err (!%p1746_p9)
}
  0x33   :  { %50 = dma.hbm_to_vmem [thread:$0]  %s1908_s3, 4096, %s45_s21, [#allocation7], %s1779_s28, %s1779_s28, %s1780_s29  }
  0x34   :  { %1772 = dma.done.wait [#allocation4], 1024  }
  0x35   :  { %1773 = vsyncadd [#allocation4], 4294966272 }
  0x36   :  { %1774 = dma.done.wait [#allocation7], 20480  }
  0x37   :  { %1775 = vsyncadd [#allocation7], 4294946816  ;;  %v1488_v0 = vld [vmem:[#allocation6 + $0x4] ss:$8 sps:$4 sm:$0xff]   ;;  %v1492_v2 = vld [vmem:[#allocation6] ss:$8 sps:$4 sm:$0xff]  }
  0x38   :  { %v1490_v1 = vld [vmem:[#allocation6 + $0x204] ss:$8 sps:$4 sm:$0xff]   ;;  %890 = vmatprep.subr.bf16.mxu1 %v1488_v0  ;;  %v1493_v3 = vld [vmem:[#allocation6 + $0x200] ss:$8 sps:$4 sm:$0xff]   ;;  %v1494_v4 = vld [vmem:[#allocation6 + $0x14] ss:$8 sps:$4 sm:$0xff]  }
  0x39   :  { %976 = vmatprep.subr.bf16.mxu0 %v1490_v1  ;;  %891 = vmatpush1.bf16.msra.mxu1 %v1492_v2  ;;  %v1496_v5 = vld [vmem:[#allocation6 + $0x214] ss:$8 sps:$4 sm:$0xff]   ;;  %v1498_v6 = vld [vmem:[#allocation6 + $0x10] ss:$8 sps:$4 sm:$0xff]   ;;  %v1500_v8 = vld [vmem:[#allocation6 + $0x24] ss:$8 sps:$4 sm:$0xff]  }
  0x3a   :  { %977 = vmatpush1.bf16.msra.mxu0 %v1493_v3  ;;  %892 = vmatprep.subr.bf16.mxu1 %v1494_v4  ;;  %v1499_v7 = vld [vmem:[#allocation6 + $0x210] ss:$8 sps:$4 sm:$0xff]   ;;  %v1502_v9 = vld [vmem:[#allocation6 + $0x224] ss:$8 sps:$4 sm:$0xff]   ;;  %v1504_v10 = vld [vmem:[#allocation6 + $0x20] ss:$8 sps:$4 sm:$0xff]  }
  0x3b   :  { %978 = vmatprep.subr.bf16.mxu0 %v1496_v5  ;;  %v1505_v11 = vld [vmem:[#allocation6 + $0x220] ss:$8 sps:$4 sm:$0xff]   ;;  %v1506_v12 = vld [vmem:[#allocation6 + $0x34] ss:$8 sps:$4 sm:$0xff]   ;;  %v1510_v14 = vld [vmem:[#allocation6 + $0x30] ss:$8 sps:$4 sm:$0xff]  }
  0x3c   :  { %v1508_v13 = vld [vmem:[#allocation6 + $0x234] ss:$8 sps:$4 sm:$0xff]   ;;  %v1511_v15 = vld [vmem:[#allocation6 + $0x230] ss:$8 sps:$4 sm:$0xff]   ;;  %v1512_v16 = vld [vmem:[#allocation6 + $0x44] ss:$8 sps:$4 sm:$0xff]  }
  0x3d   :  { %893 = vmatpush1.bf16.msra.mxu1 %v1498_v6  ;;  %v1514_v17 = vld [vmem:[#allocation6 + $0x244] ss:$8 sps:$4 sm:$0xff]   ;;  %v1516_v18 = vld [vmem:[#allocation6 + $0x40] ss:$8 sps:$4 sm:$0xff]   ;;  %v1518_v20 = vld [vmem:[#allocation6 + $0x54] ss:$8 sps:$4 sm:$0xff]  }
  0x3e   :  { %979 = vmatpush1.bf16.msra.mxu0 %v1499_v7  ;;  %894 = vmatprep.subr.bf16.mxu1 %v1500_v8  ;;  %v1517_v19 = vld [vmem:[#allocation6 + $0x240] ss:$8 sps:$4 sm:$0xff]   ;;  %v1520_v21 = vld [vmem:[#allocation6 + $0x254] ss:$8 sps:$4 sm:$0xff]   ;;  %v1522_v22 = vld [vmem:[#allocation6 + $0x50] ss:$8 sps:$4 sm:$0xff]  }
  0x3f   :  { %980 = vmatprep.subr.bf16.mxu0 %v1502_v9  ;;  %v1523_v23 = vld [vmem:[#allocation6 + $0x250] ss:$8 sps:$4 sm:$0xff]   ;;  %v1524_v24 = vld [vmem:[#allocation6 + $0x64] ss:$8 sps:$4 sm:$0xff]   ;;  %v1528_v26 = vld [vmem:[#allocation6 + $0x60] ss:$8 sps:$4 sm:$0xff]  }
  0x40   :  { %v1526_v25 = vld [vmem:[#allocation6 + $0x264] ss:$8 sps:$4 sm:$0xff]   ;;  %v1529_v27 = vld [vmem:[#allocation6 + $0x260] ss:$8 sps:$4 sm:$0xff]   ;;  %v1530_v28 = vld [vmem:[#allocation6 + $0x74] ss:$8 sps:$4 sm:$0xff]  }
  0x41   :  { %895 = vmatpush1.bf16.msra.mxu1 %v1504_v10  ;;  %v1532_v29 = vld [vmem:[#allocation6 + $0x274] ss:$8 sps:$4 sm:$0xff]   ;;  %v1534_v30 = vld [vmem:[#allocation6 + $0x70] ss:$8 sps:$4 sm:$0xff]   ;;  %v1536_v32 = vld [vmem:[#allocation6 + $0x84] ss:$8 sps:$4 sm:$0xff]  }
  0x42   :  { %981 = vmatpush1.bf16.msra.mxu0 %v1505_v11  ;;  %896 = vmatprep.subr.bf16.mxu1 %v1506_v12  ;;  %v1535_v31 = vld [vmem:[#allocation6 + $0x270] ss:$8 sps:$4 sm:$0xff]   ;;  %v1538_v33 = vld [vmem:[#allocation6 + $0x284] ss:$8 sps:$4 sm:$0xff]   ;;  %v1540_v34 = vld [vmem:[#allocation6 + $0x80] ss:$8 sps:$4 sm:$0xff]  }
  0x43   :  { %982 = vmatprep.subr.bf16.mxu0 %v1508_v13  ;;  %v1541_v35 = vld [vmem:[#allocation6 + $0x280] ss:$8 sps:$4 sm:$0xff]   ;;  %v1542_v36 = vld [vmem:[#allocation6 + $0x94] ss:$8 sps:$4 sm:$0xff]   ;;  %v1546_v38 = vld [vmem:[#allocation6 + $0x90] ss:$8 sps:$4 sm:$0xff]  }
  0x44   :  { %v1544_v37 = vld [vmem:[#allocation6 + $0x294] ss:$8 sps:$4 sm:$0xff]   ;;  %v1547_v39 = vld [vmem:[#allocation6 + $0x290] ss:$8 sps:$4 sm:$0xff]   ;;  %v1548_v40 = vld [vmem:[#allocation6 + $0xa4] ss:$8 sps:$4 sm:$0xff]  }
  0x45   :  { %897 = vmatpush1.bf16.msra.mxu1 %v1510_v14  ;;  %v1550_v41 = vld [vmem:[#allocation6 + $0x2a4] ss:$8 sps:$4 sm:$0xff]   ;;  %v1552_v42 = vld [vmem:[#allocation6 + $0xa0] ss:$8 sps:$4 sm:$0xff]   ;;  %v1554_v44 = vld [vmem:[#allocation6 + $0xb4] ss:$8 sps:$4 sm:$0xff]  }
  0x46   :  { %983 = vmatpush1.bf16.msra.mxu0 %v1511_v15  ;;  %898 = vmatprep.subr.bf16.mxu1 %v1512_v16  ;;  %v1553_v43 = vld [vmem:[#allocation6 + $0x2a0] ss:$8 sps:$4 sm:$0xff]   ;;  %v1556_v45 = vld [vmem:[#allocation6 + $0x2b4] ss:$8 sps:$4 sm:$0xff]   ;;  %v1558_v46 = vld [vmem:[#allocation6 + $0xb0] ss:$8 sps:$4 sm:$0xff]  }
  0x47   :  { %984 = vmatprep.subr.bf16.mxu0 %v1514_v17  ;;  %v1559_v47 = vld [vmem:[#allocation6 + $0x2b0] ss:$8 sps:$4 sm:$0xff]   ;;  %v74_v48 = vld [vmem:[#allocation3] sm:$0xff]  ;;  %v1566_v58 = vld [vmem:[#allocation6 + $0xd4] ss:$8 sps:$4 sm:$0xff]   ;;  %s1785_s10 = smov [#allocation9]  }
  0x48   :  { %v78_v49 = vld [vmem:[#allocation3 + $0x20] sm:$0xff]  ;;  %v76_v53 = vld [vmem:[#allocation3 + $0x10] sm:$0xff]  ;;  %s1232_s11 = sshll.u32 %s1785_s10, 4  ;;  %s1233_s11 = int_to_ptr.vmem [resolvable:$true] %s1232_s11 }
  0x49   :  { %899 = vmatpush1.bf16.msra.mxu1 %v1516_v18  ;;  %v1560_v50 = vld [vmem:[#allocation6 + $0xc4] ss:$8 sps:$4 sm:$0xff]   ;;  %v1246_v52 = vcombine.high %v74_v48, %v78_v49  ;;  %v80_v54 = vld [vmem:[#allocation3 + $0x30] sm:$0xff]  ;;  %v1564_v56 = vld [vmem:[#allocation6 + $0xc0] ss:$8 sps:$4 sm:$0xff]   ;;  %v1245_v8 = vcombine.low %v74_v48, %v78_v49  ;;  %s1750_s12 = scalar_lea.vmem %s1233_s11, 256  ;;  %p1755_p11 = scmp.lt.s32.totalorder %s1233_s11, %s1233_s11 }
  0x4a   :  { %985 = vmatpush1.bf16.msra.mxu0 %v1517_v19  ;;  %900 = vmatprep.subr.bf16.mxu1 %v1518_v20  ;;  %v1562_v51 = vld [vmem:[#allocation6 + $0x2c4] ss:$8 sps:$4 sm:$0xff]   ;;  %v1250_v55 = vcombine.high %v76_v53, %v80_v54  ;;  %v1565_v57 = vld [vmem:[#allocation6 + $0x2c0] ss:$8 sps:$4 sm:$0xff]   ;;  %v1568_v59 = vld [vmem:[#allocation6 + $0x2d4] ss:$8 sps:$4 sm:$0xff]   ;;  %v1249_v10 = vcombine.low %v76_v53, %v80_v54  ;;  %p1751_p10 = scmp.ne.s32.totalorder %s1233_s11, %s1750_s12  ;;  %p1756_p12 = scmp.lt.s32.totalorder %s1750_s12, %s1750_s12 }
  0x4b   :  { %986 = vmatprep.subr.bf16.mxu0 %v1520_v21  ;;  %922 = vmatprep.mubr.bf16.mxu1 %v1246_v52  ;;  %v1570_v60 = vld [vmem:[#allocation6 + $0xd0] ss:$8 sps:$4 sm:$0xff]   ;;  %v1572_v62 = vld [vmem:[#allocation6 + $0xe4] ss:$8 sps:$4 sm:$0xff]   ;;  %v1576_v0 = vld [vmem:[#allocation6 + $0xe0] ss:$8 sps:$4 sm:$0xff]  }
  0x4c   :  { %1008 = vmatprep.mubr.bf16.mxu0 %v1250_v55  ;;  %v1571_v61 = vld [vmem:[#allocation6 + $0x2d0] ss:$8 sps:$4 sm:$0xff]   ;;  %v1574_v63 = vld [vmem:[#allocation6 + $0x2e4] ss:$8 sps:$4 sm:$0xff]   ;;  %v1577_v1 = vld [vmem:[#allocation6 + $0x2e0] ss:$8 sps:$4 sm:$0xff]   ;;  %p1757_p13 = por %p1756_p12, %p1755_p11 }
  0x4d   :  { %901 = vmatpush1.bf16.msra.mxu1 %v1522_v22  ;;  %v1578_v2 = vld [vmem:[#allocation6 + $0xf4] ss:$8 sps:$4 sm:$0xff]   ;;  %v1582_v4 = vld [vmem:[#allocation6 + $0xf0] ss:$8 sps:$4 sm:$0xff]   ;;  %v1586_v6 = vld [vmem:[#allocation6 + $0x104] ss:$8 sps:$4 sm:$0xff]  }
  0x4e   :  { %987 = vmatpush1.bf16.msra.mxu0 %v1523_v23  ;;  %902 = vmatprep.subr.bf16.mxu1 %v1524_v24  ;;  %v1580_v3 = vld [vmem:[#allocation6 + $0x2f4] ss:$8 sps:$4 sm:$0xff]   ;;  %v1583_v5 = vld [vmem:[#allocation6 + $0x2f0] ss:$8 sps:$4 sm:$0xff]   ;;  %v1589_v7 = vld [vmem:[#allocation6 + $0x304] ss:$8 sps:$4 sm:$0xff]   ;;  %p1758_p0 = pnand %p1757_p13, %p1751_p10 }
  0x4f   :  { %988 = vmatprep.subr.bf16.mxu0 %v1526_v25  ;;  %v1584_v9 = vld [vmem:[#allocation6 + $0x100] ss:$8 sps:$4 sm:$0xff]   ;;  %v1592_v12 = vld [vmem:[#allocation6 + $0x114] ss:$8 sps:$4 sm:$0xff]   ;;  %v1590_v14 = vld [vmem:[#allocation6 + $0x110] ss:$8 sps:$4 sm:$0xff]  }
  0x50   :  { %v1587_v11 = vld [vmem:[#allocation6 + $0x300] ss:$8 sps:$4 sm:$0xff]   ;;  %v1595_v13 = vld [vmem:[#allocation6 + $0x314] ss:$8 sps:$4 sm:$0xff]   ;;  %v1593_v15 = vld [vmem:[#allocation6 + $0x310] ss:$8 sps:$4 sm:$0xff]  }
  0x51   :  { %903 = vmatpush1.bf16.msra.mxu1 %v1528_v26  ;;  %v1598_v16 = vld [vmem:[#allocation6 + $0x124] ss:$8 sps:$4 sm:$0xff]   ;;  %v1596_v18 = vld [vmem:[#allocation6 + $0x120] ss:$8 sps:$4 sm:$0xff]   ;;  %v1604_v20 = vld [vmem:[#allocation6 + $0x134] ss:$8 sps:$4 sm:$0xff]  }
  0x52   :  { %989 = vmatpush1.bf16.msra.mxu0 %v1529_v27  ;;  %904 = vmatprep.subr.bf16.mxu1 %v1530_v28  ;;  %v1601_v17 = vld [vmem:[#allocation6 + $0x324] ss:$8 sps:$4 sm:$0xff]   ;;  %v1599_v19 = vld [vmem:[#allocation6 + $0x320] ss:$8 sps:$4 sm:$0xff]   ;;  %v1607_v21 = vld [vmem:[#allocation6 + $0x334] ss:$8 sps:$4 sm:$0xff]  }
  0x53   :  { %990 = vmatprep.subr.bf16.mxu0 %v1532_v29  ;;  %v1602_v22 = vld [vmem:[#allocation6 + $0x130] ss:$8 sps:$4 sm:$0xff]   ;;  %v1610_v24 = vld [vmem:[#allocation6 + $0x144] ss:$8 sps:$4 sm:$0xff]   ;;  %v1608_v26 = vld [vmem:[#allocation6 + $0x140] ss:$8 sps:$4 sm:$0xff]  }
  0x54   :  { %v1605_v23 = vld [vmem:[#allocation6 + $0x330] ss:$8 sps:$4 sm:$0xff]   ;;  %v1613_v25 = vld [vmem:[#allocation6 + $0x344] ss:$8 sps:$4 sm:$0xff]   ;;  %v1611_v27 = vld [vmem:[#allocation6 + $0x340] ss:$8 sps:$4 sm:$0xff]  }
  0x55   :  { %905 = vmatpush1.bf16.msra.mxu1 %v1534_v30  ;;  %v1616_v28 = vld [vmem:[#allocation6 + $0x154] ss:$8 sps:$4 sm:$0xff]   ;;  %v1614_v30 = vld [vmem:[#allocation6 + $0x150] ss:$8 sps:$4 sm:$0xff]   ;;  %v1632_v48 = vld [vmem:[#allocation6 + $0x180] ss:$8 sps:$4 sm:$0xff]  }
  0x56   :  { %991 = vmatpush1.bf16.msra.mxu0 %v1535_v31  ;;  %906 = vmatprep.subr.bf16.mxu1 %v1536_v32  ;;  %v1619_v29 = vld [vmem:[#allocation6 + $0x354] ss:$8 sps:$4 sm:$0xff]   ;;  %v1617_v31 = vld [vmem:[#allocation6 + $0x350] ss:$8 sps:$4 sm:$0xff]   ;;  %v1622_v32 = vld [vmem:[#allocation6 + $0x164] ss:$8 sps:$4 sm:$0xff]  }
  0x57   :  { %992 = vmatprep.subr.bf16.mxu0 %v1538_v33  ;;  %v1625_v33 = vld [vmem:[#allocation6 + $0x364] ss:$8 sps:$4 sm:$0xff]   ;;  %v1635_v49 = vld [vmem:[#allocation6 + $0x380] ss:$8 sps:$4 sm:$0xff]   ;;  %v1638_v52 = vld [vmem:[#allocation6 + $0x190] ss:$8 sps:$4 sm:$0xff]  }
  0x58   :  { %v1641_v53 = vld [vmem:[#allocation6 + $0x390] ss:$8 sps:$4 sm:$0xff]   ;;  %v1646_v54 = vld [vmem:[#allocation6 + $0x1a4] ss:$8 sps:$4 sm:$0xff]  }
  0x59   :  { %907 = vmatpush1.bf16.msra.mxu1 %v1540_v34  ;;  %v1858_v34 = vld [vmem:[#allocation3 + $0x8] sm:$0xff] }
  0x5a   :  { %993 = vmatpush1.bf16.msra.mxu0 %v1541_v35  ;;  %908 = vmatprep.subr.bf16.mxu1 %v1542_v36  ;;  %v1860_v35 = vld [vmem:[#allocation3 + $0x28] sm:$0xff]  ;;  %v1862_v36 = vld [vmem:[#allocation3 + $0x18] sm:$0xff] }
  0x5b   :  { %994 = vmatprep.subr.bf16.mxu0 %v1544_v37  ;;  %v1864_v37 = vld [vmem:[#allocation3 + $0x38] sm:$0xff]  ;;  %v1649_v55 = vld [vmem:[#allocation6 + $0x3a4] ss:$8 sps:$4 sm:$0xff]  }
  0x5d   :  { %909 = vmatpush1.bf16.msra.mxu1 %v1546_v38  ;;  %v1620_v38 = vld [vmem:[#allocation6 + $0x160] ss:$8 sps:$4 sm:$0xff]  }
  0x5e   :  { %995 = vmatpush1.bf16.msra.mxu0 %v1547_v39  ;;  %910 = vmatprep.subr.bf16.mxu1 %v1548_v40  ;;  %v1623_v39 = vld [vmem:[#allocation6 + $0x360] ss:$8 sps:$4 sm:$0xff]   ;;  %v1248_v40 = vcombine.high %v1858_v34, %v1860_v35 }
  0x5f   :  { %996 = vmatprep.subr.bf16.mxu0 %v1550_v41  ;;  %v1628_v41 = vld [vmem:[#allocation6 + $0x174] ss:$8 sps:$4 sm:$0xff]  }
  0x61   :  { %911 = vmatpush1.bf16.msra.mxu1 %v1552_v42  ;;  %v1631_v42 = vld [vmem:[#allocation6 + $0x374] ss:$8 sps:$4 sm:$0xff]  }
  0x62   :  { %997 = vmatpush1.bf16.msra.mxu0 %v1553_v43  ;;  %912 = vmatprep.subr.bf16.mxu1 %v1554_v44  ;;  %v1252_v43 = vcombine.high %v1862_v36, %v1864_v37  ;;  %v1626_v44 = vld [vmem:[#allocation6 + $0x170] ss:$8 sps:$4 sm:$0xff]  }
  0x63   :  { %998 = vmatprep.subr.bf16.mxu0 %v1556_v45  ;;  %v1629_v45 = vld [vmem:[#allocation6 + $0x370] ss:$8 sps:$4 sm:$0xff]  }
  0x65   :  { %913 = vmatpush1.bf16.msra.mxu1 %v1558_v46  ;;  %v1634_v46 = vld [vmem:[#allocation6 + $0x184] ss:$8 sps:$4 sm:$0xff]  }
  0x66   :  { %999 = vmatpush1.bf16.msra.mxu0 %v1559_v47  ;;  %914 = vmatprep.subr.bf16.mxu1 %v1560_v50  ;;  %v1637_v47 = vld [vmem:[#allocation6 + $0x384] ss:$8 sps:$4 sm:$0xff]   ;;  %v1640_v50 = vld [vmem:[#allocation6 + $0x194] ss:$8 sps:$4 sm:$0xff]  }
  0x67   :  { %1000 = vmatprep.subr.bf16.mxu0 %v1562_v51  ;;  %v1643_v51 = vld [vmem:[#allocation6 + $0x394] ss:$8 sps:$4 sm:$0xff]  }
  0x69   :  { %915 = vmatpush1.bf16.msra.mxu1 %v1564_v56  ;;  %v1644_v56 = vld [vmem:[#allocation6 + $0x1a0] ss:$8 sps:$4 sm:$0xff]  }
  0x6a   :  { %1001 = vmatpush1.bf16.msra.mxu0 %v1565_v57  ;;  %916 = vmatprep.subr.bf16.mxu1 %v1566_v58  ;;  %v1647_v57 = vld [vmem:[#allocation6 + $0x3a0] ss:$8 sps:$4 sm:$0xff]   ;;  %v1652_v58 = vld [vmem:[#allocation6 + $0x1b4] ss:$8 sps:$4 sm:$0xff]  }
  0x6b   :  { %1002 = vmatprep.subr.bf16.mxu0 %v1568_v59  ;;  %v1655_v59 = vld [vmem:[#allocation6 + $0x3b4] ss:$8 sps:$4 sm:$0xff]  }
  0x6d   :  { %917 = vmatpush1.bf16.msra.mxu1 %v1570_v60  ;;  %v1650_v60 = vld [vmem:[#allocation6 + $0x1b0] ss:$8 sps:$4 sm:$0xff]  }
  0x6e   :  { %1003 = vmatpush1.bf16.msra.mxu0 %v1571_v61  ;;  %918 = vmatprep.subr.bf16.mxu1 %v1572_v62  ;;  %v1653_v61 = vld [vmem:[#allocation6 + $0x3b0] ss:$8 sps:$4 sm:$0xff]   ;;  %v1658_v62 = vld [vmem:[#allocation6 + $0x1c4] ss:$8 sps:$4 sm:$0xff]  }
  0x6f   :  { %1004 = vmatprep.subr.bf16.mxu0 %v1574_v63  ;;  %v1661_v63 = vld [vmem:[#allocation6 + $0x3c4] ss:$8 sps:$4 sm:$0xff]  }
  0x71   :  { %919 = vmatpush1.bf16.msra.mxu1 %v1576_v0  ;;  %v1656_v0 = vld [vmem:[#allocation6 + $0x1c0] ss:$8 sps:$4 sm:$0xff]  }
  0x72   :  { %1005 = vmatpush1.bf16.msra.mxu0 %v1577_v1  ;;  %920 = vmatprep.subr.bf16.mxu1 %v1578_v2  ;;  %v1659_v1 = vld [vmem:[#allocation6 + $0x3c0] ss:$8 sps:$4 sm:$0xff]   ;;  %v1664_v2 = vld [vmem:[#allocation6 + $0x1d4] ss:$8 sps:$4 sm:$0xff]  }
  0x73   :  { %1006 = vmatprep.subr.bf16.mxu0 %v1580_v3  ;;  %v1667_v3 = vld [vmem:[#allocation6 + $0x3d4] ss:$8 sps:$4 sm:$0xff]  }
  0x75   :  { %921 = vmatpush1.bf16.msra.mxu1 %v1582_v4  ;;  %v1662_v4 = vld [vmem:[#allocation6 + $0x1d0] ss:$8 sps:$4 sm:$0xff]  }
  0x76   :  { %1007 = vmatpush1.bf16.msra.mxu0 %v1583_v5  ;;  %933 = vmatprep.subr.bf16.mxu1 %v1586_v6  ;;  %v1665_v5 = vld [vmem:[#allocation6 + $0x3d0] ss:$8 sps:$4 sm:$0xff]   ;;  %v1670_v6 = vld [vmem:[#allocation6 + $0x1e4] ss:$8 sps:$4 sm:$0xff]  }
  0x77   :  { %1019 = vmatprep.subr.bf16.mxu0 %v1589_v7  ;;  %v1673_v7 = vld [vmem:[#allocation6 + $0x3e4] ss:$8 sps:$4 sm:$0xff]  }
  0x78   :  { %923 = vmatmul.mubr.bf16.vlgmr.msra.gmra.mrb[0].mxu1 %v1245_v8  ;;  %v1668_v8 = vld [vmem:[#allocation6 + $0x1e0] ss:$8 sps:$4 sm:$0xff]  }
  0x79   :  { %1009 = vmatmul.mubr.bf16.vlgmr.msra.gmra.mrb[0].mxu0 %v1249_v10  ;;  %934 = vmatpush1.bf16.msra.mxu1 %v1584_v9  ;;  %v1671_v9 = vld [vmem:[#allocation6 + $0x3e0] ss:$8 sps:$4 sm:$0xff]   ;;  %v1676_v10 = vld [vmem:[#allocation6 + $0x1f4] ss:$8 sps:$4 sm:$0xff]  }
  0x7a   :  { %1020 = vmatpush1.bf16.msra.mxu0 %v1587_v11  ;;  %935 = vmatprep.subr.bf16.mxu1 %v1592_v12  ;;  %v1679_v11 = vld [vmem:[#allocation6 + $0x3f4] ss:$8 sps:$4 sm:$0xff]   ;;  %v1674_v12 = vld [vmem:[#allocation6 + $0x1f0] ss:$8 sps:$4 sm:$0xff]  }
  0x7b   :  { %1021 = vmatprep.subr.bf16.mxu0 %v1595_v13  ;;  %965 = vmatprep.mubr.bf16.mxu1 %v1248_v40  ;;  %v1677_v13 = vld [vmem:[#allocation6 + $0x3f0] ss:$8 sps:$4 sm:$0xff]   ;;  %v1079_v40 = vlaneseq }
  0x7c   :  { %1051 = vmatprep.mubr.bf16.mxu0 %v1252_v43  ;;  %v1077_v43 = vld [vmem:[%s1907_s2] sm:$0x3] }
  0x7d   :  { %936 = vmatpush1.bf16.msra.mxu1 %v1590_v14  ;;  %v1247_v14 = vcombine.low %v1858_v34, %v1860_v35  ;;  %v1134_v34 = vld [vmem:[#allocation8 + $0xb8] sm:$0xff] }
  0x7e   :  { %1022 = vmatpush1.bf16.msra.mxu0 %v1593_v15  ;;  %937 = vmatprep.subr.bf16.mxu1 %v1598_v16  ;;  %v1251_v15 = vcombine.low %v1862_v36, %v1864_v37  ;;  %v1127_v16 = vld [vmem:[#allocation8 + $0x80] sm:$0xff]  ;;  %v1117_v37 = vld [vmem:[#allocation8 + $0x30] sm:$0xff] }
  0x7f   :  { %1023 = vmatprep.subr.bf16.mxu0 %v1601_v17  ;;  %v1128_v17 = vld [vmem:[#allocation8 + $0x88] sm:$0xff] }
  0x81   :  { %938 = vmatpush1.bf16.msra.mxu1 %v1596_v18  ;;  %v1111_v18 = vld [vmem:[#allocation8] sm:$0xff] }
  0x82   :  { %1024 = vmatpush1.bf16.msra.mxu0 %v1599_v19  ;;  %939 = vmatprep.subr.bf16.mxu1 %v1604_v20  ;;  %v1420_v19 = vpack.c.bf16 %v1128_v17, %v1127_v16  ;;  %v1112_v20 = vld [vmem:[#allocation8 + $0x8] sm:$0xff]  ;;  %v1139_v17 = vld [vmem:[#allocation8 + $0xe0] sm:$0xff] }
  0x83   :  { %1025 = vmatprep.subr.bf16.mxu0 %v1607_v21  ;;  %v1129_v21 = vld [vmem:[#allocation8 + $0x90] sm:$0xff] }
  0x85   :  { %940 = vmatpush1.bf16.msra.mxu1 %v1602_v22  ;;  %v1130_v22 = vld [vmem:[#allocation8 + $0x98] sm:$0xff] }
  0x86   :  { %1026 = vmatpush1.bf16.msra.mxu0 %v1605_v23  ;;  %941 = vmatprep.subr.bf16.mxu1 %v1610_v24  ;;  %v1422_v23 = vpack.c.bf16 %v1112_v20, %v1111_v18  ;;  %v1424_v24 = vpack.c.bf16 %v1130_v22, %v1129_v21  ;;  %v1140_v18 = vld [vmem:[#allocation8 + $0xe8] sm:$0xff]  ;;  %v1123_v20 = vld [vmem:[#allocation8 + $0x60] sm:$0xff]  ;;  %v1141_v22 = vld [vmem:[#allocation8 + $0xf0] sm:$0xff] }
  0x87   :  { %1027 = vmatprep.subr.bf16.mxu0 %v1613_v25  ;;  %v1113_v25 = vld [vmem:[#allocation8 + $0x10] sm:$0xff]  ;;  %v1124_v21 = vld [vmem:[#allocation8 + $0x68] sm:$0xff] }
  0x89   :  { %942 = vmatpush1.bf16.msra.mxu1 %v1608_v26  ;;  %v1114_v26 = vld [vmem:[#allocation8 + $0x18] sm:$0xff] }
  0x8a   :  { %1028 = vmatpush1.bf16.msra.mxu0 %v1611_v27  ;;  %943 = vmatprep.subr.bf16.mxu1 %v1616_v28  ;;  %v1131_v27 = vld [vmem:[#allocation8 + $0xa0] sm:$0xff]  ;;  %v1132_v28 = vld [vmem:[#allocation8 + $0xa8] sm:$0xff] }
  0x8b   :  { %1029 = vmatprep.subr.bf16.mxu0 %v1619_v29  ;;  %v1426_v29 = vpack.c.bf16 %v1114_v26, %v1113_v25  ;;  %v1125_v25 = vld [vmem:[#allocation8 + $0x70] sm:$0xff]  ;;  %v1126_v26 = vld [vmem:[#allocation8 + $0x78] sm:$0xff] }
  0x8d   :  { %944 = vmatpush1.bf16.msra.mxu1 %v1614_v30  ;;  %v1428_v30 = vpack.c.bf16 %v1132_v28, %v1131_v27  ;;  %v1450_v28 = vpack.c.bf16 %v1126_v26, %v1125_v25 }
  0x8e   :  { %1030 = vmatpush1.bf16.msra.mxu0 %v1617_v31  ;;  %945 = vmatprep.subr.bf16.mxu1 %v1622_v32  ;;  %v1115_v31 = vld [vmem:[#allocation8 + $0x20] sm:$0xff]  ;;  %v1116_v32 = vld [vmem:[#allocation8 + $0x28] sm:$0xff] }
  0x8f   :  { %1031 = vmatprep.subr.bf16.mxu0 %v1625_v33  ;;  %v1133_v33 = vld [vmem:[#allocation8 + $0xb0] sm:$0xff]  ;;  %v1430_v35 = vpack.c.bf16 %v1116_v32, %v1115_v31 }
  0x90   :  { %v1432_v36 = vpack.c.bf16 %v1134_v34, %v1133_v33 }
  0x91   :  { %946 = vmatpush1.bf16.msra.mxu1 %v1620_v38  ;;  %v1118_v38 = vld [vmem:[#allocation8 + $0x38] sm:$0xff] }
  0x92   :  { %1032 = vmatpush1.bf16.msra.mxu0 %v1623_v39  ;;  %947 = vmatprep.subr.bf16.mxu1 %v1628_v41  ;;  %v1434_v39 = vpack.c.bf16 %v1118_v38, %v1117_v37  ;;  %v1080_v41 = vshrl.u32 %v1079_v40, 7  ;;  %v1381_v40 = vld [vmem:[%s1909_s4] ss:$0 sm:$0xff] }
  0x93   :  { %1033 = vmatprep.subr.bf16.mxu0 %v1631_v42 }
  0x94   :  { %v1081_v42 = vsub.s32 0, %v1080_v41 }
  0x95   :  { %948 = vmatpush1.bf16.msra.mxu1 %v1626_v44  ;;  %v1085_v44 = vsub.s32 1, %v1080_v41 }
  0x96   :  { %1034 = vmatpush1.bf16.msra.mxu0 %v1629_v45  ;;  %949 = vmatprep.subr.bf16.mxu1 %v1634_v46  ;;  %v1082_v45 = vrot.slane %v1077_v43, %v1081_v42 }
  0x97   :  { %1035 = vmatprep.subr.bf16.mxu0 %v1637_v47 }
  0x99   :  { %950 = vmatpush1.bf16.msra.mxu1 %v1632_v48  ;;  %v1086_v48 = vrot.slane %v1077_v43, %v1085_v44 }
  0x9a   :  { %1036 = vmatpush1.bf16.msra.mxu0 %v1635_v49  ;;  %951 = vmatprep.subr.bf16.mxu1 %v1640_v50 }
  0x9b   :  { %1037 = vmatprep.subr.bf16.mxu0 %v1643_v51 }
  0x9d   :  { %952 = vmatpush1.bf16.msra.mxu1 %v1638_v52 }
  0x9e   :  { %1038 = vmatpush1.bf16.msra.mxu0 %v1641_v53  ;;  %953 = vmatprep.subr.bf16.mxu1 %v1646_v54 }
  0x9f   :  { %1039 = vmatprep.subr.bf16.mxu0 %v1649_v55 }
  0xa1   :  { %954 = vmatpush1.bf16.msra.mxu1 %v1644_v56 }
  0xa2   :  { %1040 = vmatpush1.bf16.msra.mxu0 %v1647_v57  ;;  %955 = vmatprep.subr.bf16.mxu1 %v1652_v58 }
  0xa3   :  { %1041 = vmatprep.subr.bf16.mxu0 %v1655_v59 }
  0xa5   :  { %956 = vmatpush1.bf16.msra.mxu1 %v1650_v60 }
  0xa6   :  { %1042 = vmatpush1.bf16.msra.mxu0 %v1653_v61  ;;  %957 = vmatprep.subr.bf16.mxu1 %v1658_v62 }
  0xa7   :  { %1043 = vmatprep.subr.bf16.mxu0 %v1661_v63 }
  0xa9   :  { %958 = vmatpush1.bf16.msra.mxu1 %v1656_v0 }
  0xaa   :  { %1044 = vmatpush1.bf16.msra.mxu0 %v1659_v1  ;;  %959 = vmatprep.subr.bf16.mxu1 %v1664_v2 }
  0xab   :  { %1045 = vmatprep.subr.bf16.mxu0 %v1667_v3 }
  0xad   :  { %960 = vmatpush1.bf16.msra.mxu1 %v1662_v4 }
  0xae   :  { %1046 = vmatpush1.bf16.msra.mxu0 %v1665_v5  ;;  %961 = vmatprep.subr.bf16.mxu1 %v1670_v6  ;;  %v1135_v5 = vld [vmem:[#allocation8 + $0xc0] sm:$0xff]  ;;  %v1136_v6 = vld [vmem:[#allocation8 + $0xc8] sm:$0xff] }
  0xaf   :  { %1047 = vmatprep.subr.bf16.mxu0 %v1673_v7  ;;  %v1436_v7 = vpack.c.bf16 %v1136_v6, %v1135_v5 }
  0xb1   :  { %962 = vmatpush1.bf16.msra.mxu1 %v1668_v8  ;;  %v1119_v8 = vld [vmem:[#allocation8 + $0x40] sm:$0xff] }
  0xb2   :  { %1048 = vmatpush1.bf16.msra.mxu0 %v1671_v9  ;;  %963 = vmatprep.subr.bf16.mxu1 %v1676_v10  ;;  %v1120_v9 = vld [vmem:[#allocation8 + $0x48] sm:$0xff] }
  0xb3   :  { %1049 = vmatprep.subr.bf16.mxu0 %v1679_v11  ;;  %v1438_v10 = vpack.c.bf16 %v1120_v9, %v1119_v8  ;;  %v1137_v11 = vld [vmem:[#allocation8 + $0xd0] sm:$0xff] }
  0xb5   :  { %964 = vmatpush1.bf16.msra.mxu1 %v1674_v12  ;;  %v1138_v12 = vld [vmem:[#allocation8 + $0xd8] sm:$0xff] }
  0xb6   :  { %1050 = vmatpush1.bf16.msra.mxu0 %v1677_v13  ;;  %1452 = vmatprep.subr.bf16.mxu1 %v1420_v19  ;;  %v1440_v13 = vpack.c.bf16 %v1138_v12, %v1137_v11 }
  0xb7   :  { %1421 = vmatprep.subr.bf16.mxu0 %v1420_v19  ;;  %v1444_v19 = vpack.c.bf16 %v1140_v18, %v1139_v17 }
  0xb8   :  { %966 = vmatmul.mubr.bf16.vlgmr.msra.gmra.mrb[0].mxu1 %v1247_v14  ;;  %v1121_v14 = vld [vmem:[#allocation8 + $0x50] sm:$0xff] }
  0xb9   :  { %1052 = vmatmul.mubr.bf16.vlgmr.msra.gmra.mrb[0].mxu0 %v1251_v15  ;;  %1460 = vmatpush3.bf16.msra.mxu1 %v1422_v23  ;;  %v1122_v15 = vld [vmem:[#allocation8 + $0x58] sm:$0xff] }
  0xba   :  { %1423 = vmatpush3.bf16.msra.mxu0 %v1422_v23  ;;  %1453 = vmatprep.subr.bf16.mxu1 %v1424_v24  ;;  %v1442_v16 = vpack.c.bf16 %v1122_v15, %v1121_v14  ;;  %v1446_v23 = vpack.c.bf16 %v1124_v21, %v1123_v20 }
  0xbb   :  { %1425 = vmatprep.subr.bf16.mxu0 %v1424_v24  ;;  %v1142_v24 = vld [vmem:[#allocation8 + $0xf8] sm:$0xff] }
  0xbc   :  { %v1448_v27 = vpack.c.bf16 %v1142_v24, %v1141_v22 }
  0xbd   :  { %1461 = vmatpush3.bf16.msra.mxu1 %v1426_v29 }
  0xbe   :  { %1427 = vmatpush3.bf16.msra.mxu0 %v1426_v29  ;;  %1454 = vmatprep.subr.bf16.mxu1 %v1428_v30 }
  0xbf   :  { %1429 = vmatprep.subr.bf16.mxu0 %v1428_v30 }
  0xc1   :  { %1462 = vmatpush3.bf16.msra.mxu1 %v1430_v35 }
  0xc2   :  { %1431 = vmatpush3.bf16.msra.mxu0 %v1430_v35  ;;  %1455 = vmatprep.subr.bf16.mxu1 %v1432_v36 }
  0xc3   :  { %1433 = vmatprep.subr.bf16.mxu0 %v1432_v36 }
  0xc5   :  { %1463 = vmatpush3.bf16.msra.mxu1 %v1434_v39 }
  0xc6   :  { %1435 = vmatpush3.bf16.msra.mxu0 %v1434_v39  ;;  %1456 = vmatprep.subr.bf16.mxu1 %v1436_v7 }
  0xc7   :  { %1437 = vmatprep.subr.bf16.mxu0 %v1436_v7 }
  0xc9   :  { %1464 = vmatpush3.bf16.msra.mxu1 %v1438_v10 }
  0xca   :  { %1439 = vmatpush3.bf16.msra.mxu0 %v1438_v10  ;;  %1457 = vmatprep.subr.bf16.mxu1 %v1440_v13 }
  0xcb   :  { %1441 = vmatprep.subr.bf16.mxu0 %v1440_v13 }
  0xcd   :  { %1465 = vmatpush3.bf16.msra.mxu1 %v1442_v16 }
  0xce   :  { %1443 = vmatpush3.bf16.msra.mxu0 %v1442_v16  ;;  %1458 = vmatprep.subr.bf16.mxu1 %v1444_v19 }
  0xcf   :  { %1445 = vmatprep.subr.bf16.mxu0 %v1444_v19 }
  0xd1   :  { %1466 = vmatpush3.bf16.msra.mxu1 %v1446_v23 }
  0xd2   :  { %1447 = vmatpush3.bf16.msra.mxu0 %v1446_v23  ;;  %1459 = vmatprep.subr.bf16.mxu1 %v1448_v27 }
  0xd3   :  { %1449 = vmatprep.subr.bf16.mxu0 %v1448_v27 }
  0xd5   :  { %1467 = vmatpush3.bf16.msra.mxu1 %v1450_v28 }
  0xd6   :  { %1451 = vmatpush3.bf16.msra.mxu0 %v1450_v28 }
 0x18b   :  { %v967_v46 = vpop.f32.mrb[0].mxu1 }
 0x18c   :  { %v1053_v47 = vpop.f32.mrb[0].mxu0  ;;  %v969_v50 = vpop.f32.mrb[1].mxu1 }
 0x18d   :  { %v1468_v49 = vadd.f32 %v1053_v47, %v967_v46  ;;  %v1055_v51 = vpop.f32.mrb[1].mxu0  ;;  %v971_v53 = vpop.f32.mrb[2].mxu1 }
 0x18e   :  { %v1469_v52 = vadd.f32 %v1055_v51, %v969_v50  ;;  %v1057_v54 = vpop.f32.mrb[2].mxu0  ;;  %v973_v57 = vpop.f32.mrb[3].mxu1 }
 0x18f   :  { %v1877_v55 = vadd.f32 %v1468_v49, %v1082_v45  ;;  %v1470_v56 = vadd.f32 %v1057_v54, %v971_v53  ;;  %v1059_v58 = vpop.f32.mrb[3].mxu0 }
 0x190   :  { %v1090_v59 = vadd.f32 %v1469_v52, %v1086_v48  ;;  %v1471_v60 = vadd.f32 %v1059_v58, %v973_v57 }
 0x191   :  { %v1879_v61 = vadd.f32 %v1470_v56, %v1082_v45  ;;  %v1093_v62 = vmul.f32 %v1877_v55, %v1877_v55 }
 0x192   :  { %v1092_v63 = vadd.f32 %v1471_v60, %v1086_v48  ;;  %v1094_v0 = vmul.f32 %v1090_v59, %v1090_v59 }
 0x193   :  { %v1095_v2 = vmul.f32 %v1879_v61, %v1879_v61 }
 0x194   :  { %v1097_v1 = vadd.f32 %v1094_v0, %v1093_v62  ;;  %v1096_v3 = vmul.f32 %v1092_v63, %v1092_v63 }
 0x196   :  { %1098 = vadd.xlane.f32.xlu0 %v1097_v1  ;;  %v1100_v4 = vadd.f32 %v1096_v3, %v1095_v2 }
 0x19a   :  { %1101 = vadd.xlane.f32.xlu0 %v1100_v4 }
 0x223   :  { %v1099_v29 = vpop.xlane.xlu0 %1098 }
 0x224   :  { %v1103_v30 = vmax.f32 %v1099_v29, 1e-24 }
 0x226   :  { %1680 = vrsqrt.f32 %v1103_v30 }
 0x227   :  { %v1102_v31 = vpop.xlane.xlu0 %1101 }
 0x228   :  { %v1104_v32 = vmax.f32 %v1102_v31, 1e-24 }
 0x22a   :  { %1682 = vrsqrt.f32 %v1104_v32 }
 0x230   :  { %v1681_v33 = vpop.eup %1680 }
 0x231   :  { %v1108_v34 = vmul.f32 %v1681_v33, %v1090_v59  ;;  %v1107_v35 = vmul.f32 %v1681_v33, %v1877_v55 }
 0x233   :  { %1214 = vmatprep.mubr.f32.mxu0 %v1108_v34 }
 0x234   :  { %v1683_v36 = vpop.eup %1682  ;;  %1215 = vmatmul.mubr.f32.vlgmr.msra.gmra.mrb[4].mxu0 %v1107_v35 }
 0x235   :  { %v1110_v37 = vmul.f32 %v1683_v36, %v1092_v63  ;;  %v1109_v38 = vmul.f32 %v1683_v36, %v1879_v61 }
 0x237   :  { %1219 = vmatprep.mubr.f32.mxu1 %v1110_v37 }
 0x238   :  { %1220 = vmatmul.mubr.f32.vlgmr.msra.gmra.mrb[4].mxu1 %v1109_v38 }
 0x307   :  { %v1414_v39 = vpop.f32.mrb[4].mxu0 }
 0x308   :  { %v1415_v41 = vpop.f32.mrb[5].mxu0 }
 0x309   :  { %v1416_v42 = vadd.f32 %v1415_v41, %v1414_v39 }
 0x30b   :  { %v1217_v43 = vadd.f32 %v1416_v42, %v1381_v40  ;;  %v1417_v44 = vpop.f32.mrb[4].mxu1 }
 0x30c   :  { %v1418_v45 = vpop.f32.mrb[5].mxu1 }
 0x30d   :  { %1225 = vst [vmem:[#allocation9] sm:$0xff] %v1217_v43  ;;  %v1419_v46 = vadd.f32 %v1418_v45, %v1417_v44 }
 0x30f   :  { %v1222_v47 = vadd.f32 %v1419_v46, %v1381_v40 }
 0x311   :  { %1226 = vst [vmem:[#allocation9 + $0x8] sm:$0xff] %v1222_v47 }
 0x312   :  { %1761 = shalt.err (!%p1758_p0)
}
 0x313   :  { %s1762_s14 = scalar_lea.hbm %s1910_s5, 256 }
 0x314   :  { %p1763_p1 = scmp.ne.s32.totalorder %s1910_s5, %s1762_s14  ;;  %p1766_p2 = scmp.lt.u32.totalorder %s1762_s14, %s1910_s5 }
 0x316   :  { %p1768_p3 = pnand %p1766_p2, %p1763_p1 }
 0x318   :  { %1771 = shalt.err (!%p1768_p3)
}
 0x319   :  { %1238 = dma.vmem_to_hbm [thread:$0]  %s1233_s11, 256, %s1910_s5, [#allocation5], %s1779_s28, %s1779_s28, %s1780_s29  }
 0x31a   :  { %1776 = dma.done.wait [#allocation5], 256  }
 0x31b   :  { %1777 = vsyncadd [#allocation5], 4294967040 }
 0x31c   :  { %1242 = vsyncpa [#allocation4], 1 }
 0x31d   :  { %1243 = vsyncpa [#allocation7], 1 }
 0x31e   :  { %1244 = vsyncpa [#allocation5], 1 }

</bundles_post_ra>
